<compile_context>
chip_gen: v5e
topology: v5e:2x2
jax: 0.10.0
libtpu: 0.0.40
codegen_flags: <defaults>
</compile_context>

<pallas_src>
from functools import partial

import jax
import jax.numpy as jnp
from jax.experimental import pallas as pl
from jax.experimental.pallas import tpu as pltpu


def _siamese_mlp_kernel(x1_ref, x2_ref, w1_ref, b1_ref, w2_ref, b2_ref,
                        o1_ref, o2_ref, *, apply_softmax: bool):
    B = x1_ref.shape[0]

    # Fold the pair axis into the batch dim: one (2B, D_IN) slab -> one matmul.
    x = jnp.concatenate([x1_ref[...], x2_ref[...]], axis=0)        # (2B, D_IN)

    # Shared MLP: Linear -> ReLU -> Linear (MXU matmuls, f32 accumulate).
    h = jnp.dot(x, w1_ref[...],
                preferred_element_type=jnp.float32,
                precision=jax.lax.Precision.HIGHEST)
    h = jnp.maximum(h + b1_ref[...], 0.0)                          # b1: (1, D_HID)
    logits = jnp.dot(h, w2_ref[...],
                     preferred_element_type=jnp.float32,
                     precision=jax.lax.Precision.HIGHEST)
    logits = logits + b2_ref[...]                                  # b2: (1, D_OUT)

    if apply_softmax:
        # nn.Softmax() on a 2-D input => softmax over dim=1 (features).
        m = jnp.max(logits, axis=-1, keepdims=True)
        e = jnp.exp(logits - m)
        denom = jnp.sum(e, axis=-1, keepdims=True)
        out = e / denom                                            # exact divide
    else:
        # cost_function_v=3 -> nn.Identity()
        out = logits

    # Split the fused batch back into the two branch outputs (row-aligned).
    o1_ref[...] = out[:B].astype(o1_ref.dtype)
    o2_ref[...] = out[B:].astype(o2_ref.dtype)


def combined_architecture_forward(x1, x2, w1, b1, w2, b2, *, cost_function_v=5):
    """Siamese MLP (+ final activation) for both inputs in ONE pallas_call.

    x1, x2: (B, D_IN)
    w1: (D_IN, D_HID), b1: (D_HID,), w2: (D_HID, D_OUT), b2: (D_OUT,)
    cost_function_v: 3 -> Identity final activation, 5 -> Softmax (dim=1)
    returns (y1, y2), each (B, D_OUT)
    """
    if cost_function_v not in (3, 5):
        raise ValueError("cost_function_v must be 3 (Identity) or 5 (Softmax)")

    B, _ = x1.shape
    D_HID = w1.shape[1]
    D_OUT = w2.shape[1]

    b1_2d = b1.reshape(1, D_HID)
    b2_2d = b2.reshape(1, D_OUT)

    vmem_spec = pl.BlockSpec(memory_space=pltpu.MemorySpace.VMEM)

    y1, y2 = pl.pallas_call(
        partial(_siamese_mlp_kernel, apply_softmax=(cost_function_v == 5)),
        out_shape=(
            jax.ShapeDtypeStruct((B, D_OUT), x1.dtype),
            jax.ShapeDtypeStruct((B, D_OUT), x2.dtype),
        ),
        # Single invocation (no grid): whole arrays live in VMEM, no per-step
        # pipeline overhead, no masked writebacks split across grid steps.
        in_specs=[vmem_spec] * 6,
        out_specs=(vmem_spec, vmem_spec),
    )(x1, x2, w1, b1_2d, w2, b2_2d)

    return y1, y2


if __name__ == "__main__":
    # Small shapes consistent with the module's forward (siamese 2-D inputs).
    B, D_IN, D_HID, D_OUT = 8, 32, 32, 16

    key = jax.random.PRNGKey(0)
    k_x1, k_x2, k_w1, k_b1, k_w2, k_b2 = jax.random.split(key, 6)

    x1 = jax.random.normal(k_x1, (B, D_IN), dtype=jnp.float32)
    x2 = jax.random.normal(k_x2, (B, D_IN), dtype=jnp.float32)

    # Deterministic parameter init (synthetic weights for the shared MLP).
    w1 = jax.random.normal(k_w1, (D_IN, D_HID), dtype=jnp.float32) * 0.1
    b1 = jax.random.normal(k_b1, (D_HID,), dtype=jnp.float32) * 0.1
    w2 = jax.random.normal(k_w2, (D_HID, D_OUT), dtype=jnp.float32) * 0.1
    b2 = jax.random.normal(k_b2, (D_OUT,), dtype=jnp.float32) * 0.1

    # cost_function_v=5: Softmax final activation.
    y1, y2 = combined_architecture_forward(x1, x2, w1, b1, w2, b2,
                                           cost_function_v=5)
    # cost_function_v=3: Identity final activation.
    z1, z2 = combined_architecture_forward(x1, x2, w1, b1, w2, b2,
                                           cost_function_v=3)
    jax.block_until_ready((y1, y2, z1, z2))

    # Pure-JAX reference of the same math (same matmul precision as kernel).
    def ref_logits(x):
        h = jnp.maximum(
            jnp.dot(x, w1, precision=jax.lax.Precision.HIGHEST) + b1, 0.0)
        return jnp.dot(h, w2, precision=jax.lax.Precision.HIGHEST) + b2

    r1 = jax.nn.softmax(ref_logits(x1), axis=-1)
    r2 = jax.nn.softmax(ref_logits(x2), axis=-1)
    assert jnp.allclose(y1, r1, atol=1e-5, rtol=1e-5)
    assert jnp.allclose(y2, r2, atol=1e-5, rtol=1e-5)
    assert jnp.allclose(z1, ref_logits(x1), atol=1e-5, rtol=1e-5)
    assert jnp.allclose(z2, ref_logits(x2), atol=1e-5, rtol=1e-5)

    print("KERNEL_OK")
</pallas_src>

<mosaic_0001>
module attributes {stable_mosaic.version = 11 : i64} {
  func.func @_siamese_mlp_kernel(%arg0: memref<8x32xf32, #tpu.memory_space<vmem>>, %arg1: memref<8x32xf32, #tpu.memory_space<vmem>>, %arg2: memref<32x32xf32, #tpu.memory_space<vmem>>, %arg3: memref<1x32xf32, #tpu.memory_space<vmem>>, %arg4: memref<32x16xf32, #tpu.memory_space<vmem>>, %arg5: memref<1x16xf32, #tpu.memory_space<vmem>>, %arg6: memref<8x16xf32, #tpu.memory_space<vmem>>, %arg7: memref<8x16xf32, #tpu.memory_space<vmem>>) attributes {dimension_semantics = [], scalar_prefetch = 0 : i64, scratch_operands = 0 : i64, tpu.core_type = #tpu.core_type<tc>} {
    %c0 = arith.constant 0 : index
    %c0_0 = arith.constant 0 : index
    %0 = vector.load %arg0[%c0, %c0_0] : memref<8x32xf32, #tpu.memory_space<vmem>>, vector<8x32xf32>
    %c0_1 = arith.constant 0 : index
    %c0_2 = arith.constant 0 : index
    %1 = vector.load %arg1[%c0_1, %c0_2] : memref<8x32xf32, #tpu.memory_space<vmem>>, vector<8x32xf32>
    %2 = tpu.concatenate %0, %1 in 0 : vector<8x32xf32>, vector<8x32xf32> -> vector<16x32xf32>
    %c0_3 = arith.constant 0 : index
    %c0_4 = arith.constant 0 : index
    %3 = vector.load %arg2[%c0_3, %c0_4] : memref<32x32xf32, #tpu.memory_space<vmem>>, vector<32x32xf32>
    %cst = arith.constant dense<0.000000e+00> : vector<16x32xf32>
    %4 = tpu.matmul %2, %3, %cst {dimension_numbers = #tpu.dot_dimension_numbers<[1], [0], [0], [1], [0, 0, 1, 1], [], []>, precision = #tpu.contract_precision<fp32>} : vector<16x32xf32>, vector<32x32xf32>, vector<16x32xf32> -> vector<16x32xf32>
    %c0_5 = arith.constant 0 : index
    %c0_6 = arith.constant 0 : index
    %5 = vector.load %arg3[%c0_5, %c0_6] : memref<1x32xf32, #tpu.memory_space<vmem>>, vector<1x32xf32>
    %6 = vector.broadcast %5 : vector<1x32xf32> to vector<16x32xf32>
    %7 = arith.addf %4, %6 : vector<16x32xf32>
    %cst_7 = arith.constant 0.000000e+00 : f32
    %8 = vector.broadcast %cst_7 : f32 to vector<16x32xf32>
    %9 = arith.maximumf %7, %8 : vector<16x32xf32>
    %c0_8 = arith.constant 0 : index
    %c0_9 = arith.constant 0 : index
    %10 = vector.load %arg4[%c0_8, %c0_9] : memref<32x16xf32, #tpu.memory_space<vmem>>, vector<32x16xf32>
    %cst_10 = arith.constant dense<0.000000e+00> : vector<16x16xf32>
    %11 = tpu.matmul %9, %10, %cst_10 {dimension_numbers = #tpu.dot_dimension_numbers<[1], [0], [0], [1], [0, 0, 1, 1], [], []>, precision = #tpu.contract_precision<fp32>} : vector<16x32xf32>, vector<32x16xf32>, vector<16x16xf32> -> vector<16x16xf32>
    %c0_11 = arith.constant 0 : index
    %c0_12 = arith.constant 0 : index
    %12 = vector.load %arg5[%c0_11, %c0_12] : memref<1x16xf32, #tpu.memory_space<vmem>>, vector<1x16xf32>
    %13 = vector.broadcast %12 : vector<1x16xf32> to vector<16x16xf32>
    %14 = arith.addf %11, %13 : vector<16x16xf32>
    %cst_13 = arith.constant dense<0xFF800000> : vector<16xf32>
    %15 = vector.multi_reduction <maximumf>, %14, %cst_13 [1] : vector<16x16xf32> to vector<16xf32>
    %16 = vector.shape_cast %15 : vector<16xf32> to vector<16x1xf32>
    %17 = vector.broadcast %16 : vector<16x1xf32> to vector<16x16xf32>
    %18 = arith.subf %14, %17 : vector<16x16xf32>
    %19 = math.exp %18 : vector<16x16xf32>
    %cst_14 = arith.constant dense<0.000000e+00> : vector<16xf32>
    %20 = vector.multi_reduction <add>, %19, %cst_14 [1] : vector<16x16xf32> to vector<16xf32>
    %21 = vector.shape_cast %20 : vector<16xf32> to vector<16x1xf32>
    %22 = vector.broadcast %21 : vector<16x1xf32> to vector<16x16xf32>
    %23 = arith.divf %19, %22 : vector<16x16xf32>
    %24 = vector.extract_strided_slice %23 {offsets = [0, 0], sizes = [8, 16], strides = [1, 1]} : vector<16x16xf32> to vector<8x16xf32>
    %c0_15 = arith.constant 0 : index
    %c0_16 = arith.constant 0 : index
    %25 = vector.load %arg6[%c0_15, %c0_16] : memref<8x16xf32, #tpu.memory_space<vmem>>, vector<8x16xf32>
    tpu.vector_store %arg6[%c0_15, %c0_16], %24 {strides = array<i32>} : memref<8x16xf32, #tpu.memory_space<vmem>>, vector<8x16xf32>,
    %26 = vector.extract_strided_slice %23 {offsets = [8, 0], sizes = [8, 16], strides = [1, 1]} : vector<16x16xf32> to vector<8x16xf32>
    %c0_17 = arith.constant 0 : index
    %c0_18 = arith.constant 0 : index
    %27 = vector.load %arg7[%c0_17, %c0_18] : memref<8x16xf32, #tpu.memory_space<vmem>>, vector<8x16xf32>
    tpu.vector_store %arg7[%c0_17, %c0_18], %26 {strides = array<i32>} : memref<8x16xf32, #tpu.memory_space<vmem>>, vector<8x16xf32>,
    return
  }
}

</mosaic_0001>

<bundles_post_ra>
// kernel: tpu_custom_call.1
= control target key start
LH: loop header
LB: loop body
LE: loop exit
PB: predicated region body
PF: predicated region fallthrough
CT: control target
= control target key end

     0   :  { %13 = vsyncpa [#allocation3], 0  ;;  %vm37_vm0 = vcmask 261120   ;;  %s733_s0 = inlined_call_operand.vmem [shape: f32[8,32], index: 0, kind: input, shape index: {}]   ;;  %s734_s1 = inlined_call_operand.vmem [shape: f32[8,32], index: 1, kind: input, shape index: {}]   ;;  %s735_s2 = inlined_call_operand.vmem [shape: f32[32,32], index: 2, kind: input, shape index: {}]   ;;  %s736_s3 = inlined_call_operand.vmem [shape: f32[1,32], index: 3, kind: input, shape index: {}]   ;;  %s737_s4 = inlined_call_operand.vmem [shape: f32[32,16], index: 4, kind: input, shape index: {}]   ;;  %s738_s5 = inlined_call_operand.vmem [shape: f32[1,16], index: 5, kind: input, shape index: {}]   ;;  %s739_s6 = inlined_call_operand.hbm [shape: f32[8,16], index: 6, kind: output, shape index: {0}]   ;;  %s740_s7 = inlined_call_operand.hbm [shape: f32[8,16], index: 7, kind: output, shape index: {1}]  }
   0x1   :  { %v32_v0 = vld [vmem:[%s735_s2 + $0x18] sm:$0xff]  ;;  %v31_v1 = vld [vmem:[%s735_s2 + $0x10] sm:$0xff]  ;;  %v30_v2 = vld [vmem:[%s735_s2 + $0x8] sm:$0xff] }
   0x2   :  { %v56_v3 = vand.u32 4294901760, %v32_v0  ;;  %v58_v4 = vand.u32 4294901760, %v31_v1  ;;  %v60_v5 = vand.u32 4294901760, %v30_v2  ;;  %v29_v6 = vld [vmem:[%s735_s2] sm:$0xff] }
   0x3   :  { %v27_v7 = vld [vmem:[%s733_s0] sm:$0xff]  ;;  %v62_v9 = vand.u32 4294901760, %v29_v6 }
   0x4   :  { %v28_v8 = vld [vmem:[%s734_s1] sm:$0xff]  ;;  %v39_v10 = vsel %vm37_vm0, %v27_v7, 0  ;;  %57 = vmatpush.msra.mxu0 %v56_v3  ;;  %v94_v12 = vsub.f32 %v32_v0, %v56_v3  ;;  %v100_v13 = vsub.f32 %v31_v1, %v58_v4  ;;  %174 = vmatpush.msra.mxu3 %v56_v3  ;;  %v106_v14 = vsub.f32 %v30_v2, %v60_v5 }
   0x5   :  { %v42_v11 = vsel %vm37_vm0, %v28_v8, 0  ;;  %v64_v15 = vand.u32 4294901760, %v39_v10 }
   0x6   :  { %14 = vsyncpa [#allocation5], 0  ;;  %v112_v16 = vsub.f32 %v29_v6, %v62_v9  ;;  %v72_v17 = vand.u32 4294901760, %v42_v11  ;;  %59 = vmatpush.msra.mxu0 %v58_v4  ;;  %140 = vmatpush.msra.mxu2 %v94_v12  ;;  %v95_v18 = vand.u32 4294901760, %v94_v12  ;;  %v101_v20 = vand.u32 4294901760, %v100_v13  ;;  %v265_v38 = vld [vmem:[%s737_s4 + $0x18] sm:$0xff] }
   0x7   :  { %v65_v19 = vsub.f32 %v39_v10, %v64_v15  ;;  %v107_v21 = vand.u32 4294901760, %v106_v14  ;;  %176 = vmatpush.msra.mxu3 %v58_v4  ;;  %v288_v39 = vand.u32 4294901760, %v265_v38  ;;  %v264_v40 = vld [vmem:[%s737_s4 + $0x10] sm:$0xff]  ;;  %v263_v43 = vld [vmem:[%s737_s4 + $0x8] sm:$0xff]  ;;  %v262_v47 = vld [vmem:[%s737_s4] sm:$0xff]  ;;  %vm492_vm1 = vcmask 130048  }
   0x8   :  { %v113_v22 = vand.u32 4294901760, %v112_v16  ;;  %v73_v23 = vsub.f32 %v42_v11, %v72_v17  ;;  %61 = vmatpush.msra.mxu0 %v60_v5  ;;  %143 = vmatpush.msra.mxu2 %v100_v13  ;;  %v96_v24 = vsub.f32 %v94_v12, %v95_v18  ;;  %v102_v26 = vsub.f32 %v100_v13, %v101_v20  ;;  %v577_v63 = vld [vmem:[%s736_s3] ss:$0 sm:$0xff]  ;;  %s550_s23 = sshll.u32 %s739_s6, 4  ;;  %s640_s6 = smov [#allocation4]   ;;  %s551_s23 = int_to_ptr.hbm [resolvable:$true] %s550_s23 }
   0x9   :  { %v66_v25 = vand.u32 4294901760, %v65_v19  ;;  %v108_v27 = vsub.f32 %v106_v14, %v107_v21  ;;  %178 = vmatpush.msra.mxu3 %v60_v5  ;;  %v326_v41 = vsub.f32 %v265_v38, %v288_v39  ;;  %v290_v42 = vand.u32 4294901760, %v264_v40  ;;  %v578_v38 = vld [vmem:[%s738_s5] ss:$0 sm:$0xff]  ;;  %s639_s5 = smov [#allocation2]   ;;  %s559_s24 = sshll.u32 %s640_s6, 4  ;;  %s560_s24 = int_to_ptr.vmem [resolvable:$true] %s559_s24 }
   0xa   :  { %v114_v28 = vsub.f32 %v112_v16, %v113_v22  ;;  %63 = vmatpush.msra.mxu0 %v62_v9  ;;  %v97_v29 = vand.u32 4294901760, %v96_v24  ;;  %146 = vmatpush.msra.mxu2 %v106_v14  ;;  %v103_v31 = vand.u32 4294901760, %v102_v26  ;;  %v74_v32 = vand.u32 4294901760, %v73_v23  ;;  %s548_s20 = sshll.u32 %s639_s5, 4  ;;  %s561_s27 = sshll.u32 %s740_s7, 4  ;;  %s549_s20 = int_to_ptr.vmem [resolvable:$true] %s548_s20  ;;  %s562_s27 = int_to_ptr.hbm [resolvable:$true] %s561_s27 }
   0xb   :  { %v67_v30 = vsub.f32 %v65_v19, %v66_v25  ;;  %180 = vmatpush.msra.mxu3 %v62_v9  ;;  %v109_v34 = vand.u32 4294901760, %v108_v27  ;;  %v327_v44 = vand.u32 4294901760, %v326_v41  ;;  %v332_v45 = vsub.f32 %v264_v40, %v290_v42 }
   0xc   :  { %209 = vmatpush.msrb.mxu0 %v95_v18  ;;  %98 = vmatpush.msra.mxu1 %v97_v29  ;;  %v115_v35 = vand.u32 4294901760, %v114_v28  ;;  %v75_v36 = vsub.f32 %v73_v23, %v74_v32  ;;  %v292_v46 = vand.u32 4294901760, %v263_v43  ;;  %v294_v51 = vand.u32 4294901760, %v262_v47 }
   0xd   :  { %v68_v33 = vand.u32 4294901760, %v67_v30  ;;  %149 = vmatpush.msra.mxu2 %v112_v16  ;;  %184 = vmatmul.f32.vlgmr.msra.gmra.mxu3 %v66_v25  ;;  %v328_v48 = vsub.f32 %v326_v41, %v327_v44  ;;  %v333_v49 = vand.u32 4294901760, %v332_v45 }
   0xe   :  { %152 = vmatmul.f32.vlgmr.msra.gmra.mxu2 %v65_v19  ;;  %104 = vmatpush.msra.mxu1 %v103_v31  ;;  %v76_v37 = vand.u32 4294901760, %v75_v36  ;;  %v338_v50 = vsub.f32 %v263_v43, %v292_v46  ;;  %v344_v55 = vsub.f32 %v262_v47, %v294_v51 }
   0xf   :  { %69 = vmatmul.f32.vlgmr.msra.gmra.mxu0 %v68_v33  ;;  %289 = vmatpush.msrb.mxu2 %v288_v39  ;;  %v329_v52 = vand.u32 4294901760, %v328_v48  ;;  %v334_v53 = vsub.f32 %v332_v45, %v333_v49 }
  0x10   :  { %213 = vmatpush.msrb.mxu0 %v101_v20  ;;  %110 = vmatpush.msra.mxu1 %v109_v34  ;;  %v339_v54 = vand.u32 4294901760, %v338_v50  ;;  %v345_v58 = vand.u32 4294901760, %v344_v55 }
  0x11   :  { %291 = vmatpush.msrb.mxu2 %v290_v42  ;;  %330 = vmatpush.msrb.mxu3 %v329_v52  ;;  %v335_v56 = vand.u32 4294901760, %v334_v53 }
  0x12   :  { %217 = vmatpush.msrb.mxu0 %v107_v21  ;;  %116 = vmatpush.msra.mxu1 %v115_v35  ;;  %v340_v57 = vsub.f32 %v338_v50, %v339_v54  ;;  %v346_v60 = vsub.f32 %v344_v55, %v345_v58 }
  0x13   :  { %118 = vmatmul.f32.vlgmr.msra.gmra.mxu1 %v64_v15  ;;  %293 = vmatpush.msrb.mxu2 %v292_v46 }
  0x14   :  { %221 = vmatpush.msrb.mxu0 %v113_v22  ;;  %244 = vmatpush.msrb.mxu1 %v56_v3  ;;  %v341_v59 = vand.u32 4294901760, %v340_v57  ;;  %v347_v61 = vand.u32 4294901760, %v346_v60 }
  0x15   :  { %190 = vmatmul.f32.gmra.mxu3 %v74_v32  ;;  %295 = vmatpush.msrb.mxu2 %v294_v51 }
  0x16   :  { %157 = vmatmul.f32.gmra.mxu2 %v73_v23  ;;  %246 = vmatpush.msrb.mxu1 %v58_v4 }
  0x17   :  { %77 = vmatmul.f32.gmra.mxu0 %v76_v37  ;;  %441 = vmatpush.msra.mxu2 %v327_v44 }
  0x18   :  { %248 = vmatpush.msrb.mxu1 %v60_v5  ;;  %372 = vmatpush.msra.mxu0 %v326_v41 }
  0x19   :  { %445 = vmatpush.msra.mxu2 %v333_v49  ;;  %336 = vmatpush.msrb.mxu3 %v335_v56 }
  0x1a   :  { %250 = vmatpush.msrb.mxu1 %v62_v9  ;;  %375 = vmatpush.msra.mxu0 %v332_v45 }
  0x1b   :  { %122 = vmatmul.f32.gmra.mxu1 %v72_v17  ;;  %449 = vmatpush.msra.mxu2 %v339_v54 }
  0x1c   :  { %406 = vmatpush.msra.mxu1 %v288_v39  ;;  %378 = vmatpush.msra.mxu0 %v338_v50 }
  0x1d   :  { %342 = vmatpush.msrb.mxu3 %v341_v59  ;;  %453 = vmatpush.msra.mxu2 %v345_v58 }
  0x1e   :  { %408 = vmatpush.msra.mxu1 %v290_v42  ;;  %381 = vmatpush.msra.mxu0 %v344_v55 }
  0x1f   :  { %223 = vmatmul.f32.vlgmr.msrb.gmra.mxu0 %v64_v15  ;;  %348 = vmatpush.msrb.mxu3 %v347_v61 }
  0x20   :  { %410 = vmatpush.msra.mxu1 %v292_v46 }
  0x21   :  { %476 = vmatpush.msra.mxu3 %v288_v39 }
  0x22   :  { %412 = vmatpush.msra.mxu1 %v294_v51 }
  0x23   :  { %252 = vmatmul.f32.vlgmr.msrb.gmra.mxu1 %v64_v15  ;;  %478 = vmatpush.msra.mxu3 %v290_v42 }
  0x25   :  { %480 = vmatpush.msra.mxu3 %v292_v46 }
  0x27   :  { %227 = vmatmul.f32.gmra.mxu0 %v72_v17  ;;  %482 = vmatpush.msra.mxu3 %v294_v51 }
  0x2b   :  { %256 = vmatmul.f32.gmra.mxu1 %v72_v17 }
  0x8c   :  { %v70_v62 = vpop.f32.mrf.mxu0 }
  0x8d   :  { %v71_v1 = vadd.f32 %v577_v63, %v70_v62 }
  0x90   :  { %v119_v0 = vpop.f32.mrf.mxu1  ;;  %v185_v5 = vpop.f32.mrf.mxu3 }
  0x91   :  { %v153_v3 = vpop.f32.mrf.mxu2  ;;  %v120_v4 = vadd.f32 %v119_v0, %v71_v1 }
  0x93   :  { %v154_v8 = vadd.f32 %v153_v3, %v120_v4 }
  0x94   :  { %v78_v2 = vpop.f32.mrf.mxu0 }
  0x95   :  { %v79_v7 = vadd.f32 %v577_v63, %v78_v2  ;;  %v186_v10 = vadd.f32 %v185_v5, %v154_v8 }
  0x98   :  { %v123_v6 = vpop.f32.mrf.mxu1  ;;  %v191_v17 = vpop.f32.mrf.mxu3 }
  0x99   :  { %v124_v11 = vadd.f32 %v123_v6, %v79_v7  ;;  %v158_v12 = vpop.f32.mrf.mxu2 }
  0x9b   :  { %v159_v15 = vadd.f32 %v158_v12, %v124_v11 }
  0x9c   :  { %v224_v9 = vpop.f32.mrf.mxu0 }
  0x9d   :  { %v225_v13 = vadd.f32 %v224_v9, %v186_v10  ;;  %v192_v20 = vadd.f32 %v191_v17, %v159_v15 }
  0xa0   :  { %v253_v14 = vpop.f32.mrf.mxu1 }
  0xa1   :  { %v254_v16 = vadd.f32 %v253_v14, %v225_v13 }
  0xa3   :  { %v260_v18 = vmax.f32 %v254_v16, 0.0 }
  0xa4   :  { %v228_v19 = vpop.f32.mrf.mxu0 }
  0xa5   :  { %v271_v21 = vsel %vm37_vm0, %v260_v18, 0  ;;  %v229_v23 = vadd.f32 %v228_v19, %v192_v20 }
  0xa6   :  { %v296_v22 = vand.u32 4294901760, %v271_v21 }
  0xa8   :  { %v297_v24 = vsub.f32 %v271_v21, %v296_v22  ;;  %v257_v25 = vpop.f32.mrf.mxu1  ;;  %350 = vmatmul.f32.vlgmr.msrb.gmra.mxu3 %v296_v22 }
  0xa9   :  { %v258_v26 = vadd.f32 %v257_v25, %v229_v23 }
  0xaa   :  { %384 = vmatmul.f32.vlgmr.msra.gmra.mxu0 %v297_v24  ;;  %v298_v27 = vand.u32 4294901760, %v297_v24 }
  0xab   :  { %v261_v28 = vmax.f32 %v258_v26, 0.0 }
  0xac   :  { %416 = vmatmul.f32.vlgmr.msra.gmra.mxu1 %v298_v27  ;;  %v299_v29 = vsub.f32 %v297_v24, %v298_v27 }
  0xad   :  { %v274_v30 = vsel %vm37_vm0, %v261_v28, 0 }
  0xae   :  { %v304_v31 = vand.u32 4294901760, %v274_v30  ;;  %v300_v32 = vand.u32 4294901760, %v299_v29 }
  0xb0   :  { %301 = vmatmul.f32.vlgmr.msrb.gmra.mxu2 %v300_v32  ;;  %354 = vmatmul.f32.gmra.mxu3 %v304_v31  ;;  %v305_v33 = vsub.f32 %v274_v30, %v304_v31 }
  0xb2   :  { %389 = vmatmul.f32.gmra.mxu0 %v305_v33  ;;  %v306_v34 = vand.u32 4294901760, %v305_v33 }
  0xb4   :  { %422 = vmatmul.f32.gmra.mxu1 %v306_v34  ;;  %v307_v35 = vsub.f32 %v305_v33, %v306_v34 }
  0xb6   :  { %v308_v36 = vand.u32 4294901760, %v307_v35 }
  0xb8   :  { %309 = vmatmul.f32.gmra.mxu2 %v308_v36  ;;  %484 = vmatmul.f32.vlgmr.msra.gmra.mxu3 %v296_v22 }
  0xc0   :  { %455 = vmatmul.f32.vlgmr.msra.gmra.mxu2 %v296_v22  ;;  %488 = vmatmul.f32.gmra.mxu3 %v304_v31 }
  0xc8   :  { %459 = vmatmul.f32.gmra.mxu2 %v304_v31 }
 0x127   :  { %v385_v43 = vpop.f32.mrf.mxu0 }
 0x129   :  { %v417_v47 = vpop.f32.mrf.mxu1 }
 0x12b   :  { %v351_v37 = vpop.f32.mrf.mxu3 }
 0x12f   :  { %v390_v53 = vpop.f32.mrf.mxu0 }
 0x131   :  { %v423_v57 = vpop.f32.mrf.mxu1 }
 0x133   :  { %v302_v39 = vpop.f32.mrf.mxu2  ;;  %v355_v41 = vpop.f32.mrf.mxu3 }
 0x134   :  { %v303_v40 = vadd.f32 %v578_v38, %v302_v39 }
 0x136   :  { %v352_v42 = vadd.f32 %v351_v37, %v303_v40 }
 0x138   :  { %v386_v46 = vadd.f32 %v385_v43, %v352_v42 }
 0x13a   :  { %v418_v49 = vadd.f32 %v417_v47, %v386_v46 }
 0x13b   :  { %v310_v44 = vpop.f32.mrf.mxu2  ;;  %v485_v50 = vpop.f32.mrf.mxu3 }
 0x13c   :  { %v311_v45 = vadd.f32 %v578_v38, %v310_v44 }
 0x13e   :  { %v356_v48 = vadd.f32 %v355_v41, %v311_v45 }
 0x140   :  { %v391_v55 = vadd.f32 %v390_v53, %v356_v48 }
 0x142   :  { %v424_v58 = vadd.f32 %v423_v57, %v391_v55 }
 0x143   :  { %v456_v51 = vpop.f32.mrf.mxu2  ;;  %v489_v61 = vpop.f32.mrf.mxu3 }
 0x144   :  { %v457_v52 = vadd.f32 %v456_v51, %v418_v49 }
 0x146   :  { %v486_v54 = vadd.f32 %v485_v50, %v457_v52 }
 0x148   :  { %v493_v56 = vsel %vm492_vm1, %v486_v54, -inf }
 0x149   :  { %494 = vmax.xlane.f32.xlu0 %v493_v56 }
 0x14b   :  { %v460_v59 = vpop.f32.mrf.mxu2 }
 0x14c   :  { %v461_v60 = vadd.f32 %v460_v59, %v424_v58 }
 0x14e   :  { %v490_v62 = vadd.f32 %v489_v61, %v461_v60 }
 0x150   :  { %v496_v63 = vsel %vm492_vm1, %v490_v62, -inf }
 0x151   :  { %497 = vmax.xlane.f32.xlu0 %v496_v63 }
 0x1bc   :  { %v495_v0 = vpop.xlane.xlu0 %494 }
 0x1bd   :  { %v499_v1 = vsub.f32 %v486_v54, %v495_v0 }
 0x1bf   :  { %v501_v2 = vmul.f32 1.442695, %v499_v1 }
 0x1c1   :  { %579 = vpow2.f32 %v501_v2 }
 0x1c4   :  { %v498_v3 = vpop.xlane.xlu0 %497 }
 0x1c5   :  { %v500_v4 = vsub.f32 %v490_v62, %v498_v3 }
 0x1c7   :  { %v580_v5 = vpop.eup %579  ;;  %v503_v6 = vmul.f32 1.442695, %v500_v4 }
 0x1c8   :  { %v505_v7 = vsel %vm492_vm1, %v580_v5, 0.0 }
 0x1c9   :  { %581 = vpow2.f32 %v503_v6  ;;  %506 = vadd.xlane.f32.xlu1 %v505_v7 }
 0x1cf   :  { %v582_v8 = vpop.eup %581 }
 0x1d0   :  { %v508_v9 = vsel %vm492_vm1, %v582_v8, 0.0 }
 0x1d1   :  { %509 = vadd.xlane.f32.xlu1 %v508_v9 }
 0x23c   :  { %v507_v10 = vpop.xlane.xlu1 %506 }
 0x23d   :  { %583 = vrcp.f32 %v507_v10  ;;  %v522_v15 = vand.u32 2147483648, %v507_v10  ;;  %v520_v17 = vand.u32 2147483647, %v507_v10  ;;  %vm516_vm3 = vweird.f32 %v507_v10 }
 0x23f   :  { %v523_v20 = vor.u32 1.1754944e-38, %v522_v15  ;;  %vm521_vm5 = vcmp.eq.f32.partialorder %v520_v17, 8.507059e+37 }
 0x243   :  { %v584_v11 = vpop.eup %583 }
 0x244   :  { %v512_v12 = vmul.f32 %v584_v11, %v507_v10  ;;  %v510_v13 = vpop.xlane.xlu1 %509  ;;  %vm517_vm2 = vweird.f32 %v584_v11 }
 0x245   :  { %585 = vrcp.f32 %v510_v13  ;;  %vm518_vm4 = vmor %vm516_vm3, %vm517_vm2  ;;  %v537_v26 = vand.u32 2147483648, %v510_v13  ;;  %v535_v28 = vand.u32 2147483647, %v510_v13  ;;  %vm531_vm7 = vweird.f32 %v510_v13 }
 0x246   :  { %v513_v14 = vsub.f32 1.0, %v512_v12 }
 0x247   :  { %v538_v30 = vor.u32 1.1754944e-38, %v537_v26  ;;  %vm536_vm9 = vcmp.eq.f32.partialorder %v535_v28, 8.507059e+37 }
 0x248   :  { %v514_v16 = vmul.f32 %v584_v11, %v513_v14 }
 0x24a   :  { %v515_v18 = vadd.f32 %v584_v11, %v514_v16 }
 0x24b   :  { %v586_v19 = vpop.eup %585 }
 0x24c   :  { %v527_v21 = vmul.f32 %v586_v19, %v510_v13  ;;  %v519_v22 = vsel %vm518_vm4, %v584_v11, %v515_v18  ;;  %vm532_vm6 = vweird.f32 %v586_v19 }
 0x24d   :  { %v524_v23 = vsel %vm521_vm5, %v523_v20, %v519_v22  ;;  %vm533_vm8 = vmor %vm531_vm7, %vm532_vm6 }
 0x24e   :  { %v528_v24 = vsub.f32 1.0, %v527_v21  ;;  %v525_v25 = vmul.f32 %v580_v5, %v524_v23 }
 0x250   :  { %v529_v27 = vmul.f32 %v586_v19, %v528_v24  ;;  %541 = vst.msk [vmem:[#allocation2] sm:$0xff] %vm492_vm1, %v525_v25 }
 0x251   :  { %553 = dma.vmem_to_hbm [thread:$0]  %s549_s20, 128, %s551_s23, [#allocation3]  }
 0x252   :  { %v530_v29 = vadd.f32 %v586_v19, %v529_v27 }
 0x254   :  { %v534_v31 = vsel %vm533_vm8, %v586_v19, %v530_v29 }
 0x255   :  { %v539_v32 = vsel %vm536_vm9, %v538_v30, %v534_v31 }
 0x256   :  { %v540_v33 = vmul.f32 %v582_v8, %v539_v32 }
 0x258   :  { %542 = vst.msk [vmem:[#allocation4] sm:$0xff] %vm492_vm1, %v540_v33 }
 0x259   :  { %564 = dma.vmem_to_hbm [thread:$0]  %s560_s24, 128, %s562_s27, [#allocation5]  }
 0x25a   :  { %635 = dma.done.wait [#allocation3], 128  }
 0x25b   :  { %636 = vsyncadd [#allocation3], 4294967168 }
 0x25c   :  { %637 = dma.done.wait [#allocation5], 128  }
 0x25d   :  { %638 = vsyncadd [#allocation5], 4294967168 }
 0x25e   :  { %573 = vsyncpa [#allocation3], 1 }
 0x25f   :  { %574 = vsyncpa [#allocation5], 1 }

</bundles_post_ra>
